<compile_context>
chip_gen: v7x
topology: tpu7x:2x2x1
jax: 0.10.0
libtpu: 0.0.40
codegen_flags: <defaults>
</compile_context>

<pallas_src>
import math
import functools

import jax
import jax.numpy as jnp
from jax.experimental import pallas as pl
from jax.experimental.pallas import tpu as pltpu


def make_pos_embedding(emb_size: int, maxlen: int = 5000, dtype=jnp.float32):
    """Deterministic buffer construction, identical to the torch __init__."""
    den = jnp.exp(
        -jnp.arange(0, emb_size, 2, dtype=jnp.float32) * math.log(10000.0) / emb_size
    )
    pos = jnp.arange(0, maxlen, dtype=jnp.float32).reshape(maxlen, 1)
    pe = jnp.zeros((maxlen, emb_size), dtype=jnp.float32)
    pe = pe.at[:, 0::2].set(jnp.sin(pos * den))
    pe = pe.at[:, 1::2].set(jnp.cos(pos * den))
    return pe[:, None, :].astype(dtype)  # (maxlen, 1, emb_size)


def _pe_kernel(seed_ref, x_ref, pe_ref, o_ref, *, p: float, training: bool, batch: int):
    # x_ref/o_ref: (TS, B*E) VMEM tiles; pe_ref: (TS, E) VMEM tile; seed in SMEM.
    x = x_ref[...]                       # native dtype, no blanket f32 upcast
    pe = pe_ref[...]                     # already pre-cast to x dtype host-side
    # Lane-replicate the PE row B times so it lines up with the folded batch.
    pe_b = jnp.tile(pe, (1, batch)) if batch > 1 else pe
    y = x + pe_b

    if training and p > 0.0:
        if p >= 1.0:
            # Degenerate dropout(p=1): everything is dropped.
            y = jnp.zeros_like(y)
        else:
            # Inverted dropout with the TPU hardware PRNG; per-tile seed so
            # different seq tiles draw different random streams.
            pltpu.prng_seed(seed_ref[0], pl.program_id(0))
            bits = pltpu.bitcast(pltpu.prng_random_bits(y.shape), jnp.uint32)
            # keep iff bits >= p * 2^32  (integer threshold: no shift/convert)
            thresh = jnp.uint32(min(int(round(p * (2.0 ** 32))), (1 << 32) - 1))
            keep = bits >= thresh
            scale = jnp.asarray(1.0 / (1.0 - p), dtype=y.dtype)
            y = jnp.where(keep, y * scale, jnp.zeros_like(y))

    o_ref[...] = y.astype(o_ref.dtype)


# Scoped-VMEM budget: <= 64 MiB/TC on v7x, >> 16 MiB scoped default on v5e.
_VMEM_LIMIT_BYTES = 48 * 1024 * 1024
# Leave headroom under the limit for compiler-internal scratch.
_VMEM_BUDGET_BYTES = 40 * 1024 * 1024
# Past this per-tile x size the streaming roofline is flat even at v7x's HBM BW.
_TARGET_TILE_BYTES = 8 * 1024 * 1024
_MIN_GRID_STEPS = 4  # keep DMA/compute overlap + >=2 tiles/TC on megacore parts


def _sublane_pack(itemsize: int) -> int:
    return {1: 32, 2: 16, 4: 8}.get(itemsize, 8)


def _choose_block_rows(S: int, B: int, E: int, itemsize: int, training: bool) -> int:
    """Largest seq-tile that double-buffers under the VMEM budget."""
    row_x = B * E * itemsize      # one row of the x (== out) block
    row_pe = E * itemsize         # one row of the pe block
    # Per-row footprint: (x + out) blocks double-buffered, pe double-buffered,
    # plus compute temporaries (result in native dtype; u32 PRNG bits if training).
    per_row = 2 * 2 * row_x + 2 * row_pe + row_x + (B * E * 4 if training else 0)
    ts = _VMEM_BUDGET_BYTES // max(1, per_row)
    # Per-tile streaming target (~8 MiB of x): bigger buys nothing, wastes VMEM.
    ts = min(ts, _TARGET_TILE_BYTES // max(1, row_x))
    # Keep at least ~_MIN_GRID_STEPS grid steps when the sequence allows it.
    ts = min(ts, -(-S // _MIN_GRID_STEPS))
    pack = _sublane_pack(itemsize)
    ts = max(pack, (ts // pack) * pack)   # dtype-pack aligned second-minor dim
    return int(min(ts, S))


def positional_encoding_forward(
    token_embedding: jax.Array,
    pos_embedding: jax.Array,
    *,
    dropout_p: float,
    training: bool = False,
    seed: int = 0,
    block_rows: int | None = None,
    donate_input: bool = False,
) -> jax.Array:
    """Equivalent of PositionalEncoding.forward(token_embedding)."""
    S, B, E = token_embedding.shape
    dtype = token_embedding.dtype
    itemsize = jnp.dtype(dtype).itemsize

    # Glue work in plain JAX (free / fused by XLA):
    pe_slice = pos_embedding[:S, 0, :].astype(dtype)   # (S, E), pre-cast to x dtype
    x2d = token_embedding.reshape(S, B * E)            # fold batch into the lane dim
    seed_arr = jnp.asarray([seed], dtype=jnp.int32)

    if block_rows is None:
        TS = _choose_block_rows(S, B, E, itemsize, bool(training))
    else:
        pack = _sublane_pack(itemsize)
        TS = max(pack, (int(block_rows) // pack) * pack)
        TS = min(TS, S)
    grid = (pl.cdiv(S, TS),)

    kernel = functools.partial(
        _pe_kernel, p=float(dropout_p), training=bool(training), batch=int(B)
    )

    out2d = pl.pallas_call(
        kernel,
        out_shape=jax.ShapeDtypeStruct((S, B * E), dtype),
        grid_spec=pltpu.PrefetchScalarGridSpec(
            num_scalar_prefetch=1,  # dropout seed lives in SMEM
            grid=grid,
            in_specs=[
                # x tile: (TS, B*E) -> lane-dense, TS is the second-minor dim.
                pl.BlockSpec((TS, B * E), lambda i, seed_ref: (i, 0)),
                # pe tile: fetched once per seq tile (1x HBM traffic).
                pl.BlockSpec((TS, E), lambda i, seed_ref: (i, 0)),
            ],
            out_specs=pl.BlockSpec((TS, B * E), lambda i, seed_ref: (i, 0)),
        ),
        compiler_params=pltpu.CompilerParams(
            # Independent seq tiles -> shard across TensorCores on megacore parts.
            dimension_semantics=("parallel",),
            vmem_limit_bytes=_VMEM_LIMIT_BYTES,
        ),
        # Operand 0 is the prefetched seed, so token_embedding is operand 1.
        input_output_aliases=({1: 0} if donate_input else {}),
    )(seed_arr, x2d, pe_slice)

    return out2d.reshape(S, B, E)


if __name__ == "__main__":
    # Small shapes consistent with the module: seq=8, batch=2, emb_size=32.
    S, B, E = 8, 2, 32
    dropout_p = 0.1
    maxlen = 5000

    key = jax.random.PRNGKey(0)
    x = jax.random.normal(key, (S, B, E), dtype=jnp.float32)

    pos_embedding = make_pos_embedding(E, maxlen=maxlen)  # (maxlen, 1, E)

    # Eval-mode forward (dropout is identity) -- deterministic, checkable.
    out = positional_encoding_forward(
        x, pos_embedding, dropout_p=dropout_p, training=False
    )
    out = jax.block_until_ready(out)

    # Pure-JAX reference of the torch forward in eval mode.
    ref = x + pos_embedding[:S]  # (S, 1, E) broadcasts over batch
    assert out.shape == (S, B, E)
    assert jnp.allclose(out, ref, atol=1e-6, rtol=1e-6), "mismatch vs reference"

    # Training (dropout) path uses the TPU hardware PRNG, which has no CPU /
    # interpret-mode lowering -- only exercise it on a real TPU backend.
    if jax.default_backend() == "tpu":
        out_train = positional_encoding_forward(
            x, pos_embedding, dropout_p=dropout_p, training=True, seed=1234
        )
        out_train = jax.block_until_ready(out_train)
        scale = 1.0 / (1.0 - dropout_p)
        kept = out_train != 0
        # Every kept element must equal ref * 1/(1-p); dropped elements are 0.
        assert jnp.allclose(
            jnp.where(kept, out_train, ref * scale), ref * scale, atol=1e-5, rtol=1e-5
        ), "dropout path mismatch"

    print("KERNEL_OK")
</pallas_src>

<mosaic_0001>
module attributes {stable_mosaic.version = 11 : i64} {
  func.func @_pe_kernel(%arg0: i32, %arg1: memref<1xi32, #tpu.memory_space<smem>>, %arg2: memref<8x64xf32, #tpu.memory_space<vmem>>, %arg3: memref<8x32xf32, #tpu.memory_space<vmem>>, %arg4: memref<8x64xf32, #tpu.memory_space<vmem>>) attributes {dimension_semantics = [#tpu.dimension_semantics<parallel>], iteration_bounds = array<i64: 1>, scalar_prefetch = 1 : i64, scratch_operands = 0 : i64, tpu.core_type = #tpu.core_type<tc>, window_params = [{transform_indices = @transform_0, window_bounds = array<i64: 8, 64>}, {transform_indices = @transform_1, window_bounds = array<i64: 8, 32>}, {transform_indices = @transform_2, window_bounds = array<i64: 8, 64>}]} {
    %c0 = arith.constant 0 : index
    %c0_0 = arith.constant 0 : index
    %0 = vector.load %arg2[%c0, %c0_0] : memref<8x64xf32, #tpu.memory_space<vmem>>, vector<8x64xf32>
    %c0_1 = arith.constant 0 : index
    %c0_2 = arith.constant 0 : index
    %1 = vector.load %arg3[%c0_1, %c0_2] : memref<8x32xf32, #tpu.memory_space<vmem>>, vector<8x32xf32>
    %2 = tpu.concatenate %1, %1 in 1 : vector<8x32xf32>, vector<8x32xf32> -> vector<8x64xf32>
    %3 = arith.addf %0, %2 : vector<8x64xf32>
    %c0_3 = arith.constant 0 : index
    %c0_4 = arith.constant 0 : index
    %4 = vector.load %arg4[%c0_3, %c0_4] : memref<8x64xf32, #tpu.memory_space<vmem>>, vector<8x64xf32>
    tpu.vector_store %arg4[%c0_3, %c0_4], %3 {strides = array<i32>} : memref<8x64xf32, #tpu.memory_space<vmem>>, vector<8x64xf32>,
    return
  }
  func.func @transform_0(%arg0: i32, %arg1: memref<1xi32, #tpu.memory_space<smem>>) -> (i32, i32) {
    %c0_i32 = arith.constant 0 : i32
    %c0_i32_0 = arith.constant 0 : i32
    return %arg0, %c0_i32 : i32, i32
  }
  func.func @transform_1(%arg0: i32, %arg1: memref<1xi32, #tpu.memory_space<smem>>) -> (i32, i32) {
    %c0_i32 = arith.constant 0 : i32
    %c0_i32_0 = arith.constant 0 : i32
    return %arg0, %c0_i32 : i32, i32
  }
  func.func @transform_2(%arg0: i32, %arg1: memref<1xi32, #tpu.memory_space<smem>>) -> (i32, i32) {
    %c0_i32 = arith.constant 0 : i32
    %c0_i32_0 = arith.constant 0 : i32
    return %arg0, %c0_i32 : i32, i32
  }
}

</mosaic_0001>

<bundles_post_ra>
// kernel: tpu_custom_call.1
= control target key start
LH: loop header
LB: loop body
LE: loop exit
PB: predicated region body
PF: predicated region fallthrough
CT: control target
= control target key end

     0   :  { %9 = vsyncpa [#allocation5], 0  ;;  %s201_s0 = inlined_call_operand.<no memory space> [shape: s32[1], index: 0, kind: input, shape index: {}]   ;;  %s202_s1 = inlined_call_operand.hbm [shape: f32[8,64], index: 1, kind: input, shape index: {}]   ;;  %s203_s2 = inlined_call_operand.hbm [shape: f32[8,32], index: 2, kind: input, shape index: {}]   ;;  %s204_s3 = inlined_call_operand.hbm [shape: f32[8,64], index: 3, kind: output, shape index: {}]  }
   0x1   :  { %10 = vsyncpa [#allocation8], 0 }
   0x2   :  { %11 = vsyncpa [#allocation6], 0  ;;  %s141_s12 = smov [#allocation4]   ;;  %s142_s14 = smov [#allocation7]  }
   0x3   :  { %s18_s13 = sshll.u32 %s141_s12, 4  ;;  %s28_s15 = sshll.u32 %s142_s14, 4  ;;  %s19_s13 = int_to_ptr.vmem [resolvable:$true] %s18_s13  ;;  %s29_s15 = int_to_ptr.vmem [resolvable:$true] %s28_s15 }
   0x4   :  { %s69_s17 = scalar_lea.hbm %s202_s1, 128 }
   0x5   :  { %p70_p0 = scmp.ne.s32.totalorder %s202_s1, %s69_s17  ;;  %p73_p1 = scmp.lt.u32.totalorder %s69_s17, %s202_s1 }
   0x7   :  { %p75_p2 = pnand %p73_p1, %p70_p0 }
   0x9   :  { %78 = shalt.err (!%p75_p2)
}
   0xa   :  { %s79_s22 = scalar_lea.vmem %s19_s13, 128  ;;  %p84_p4 = scmp.lt.s32.totalorder %s19_s13, %s19_s13 }
   0xb   :  { %p80_p3 = scmp.ne.s32.totalorder %s19_s13, %s79_s22  ;;  %p85_p5 = scmp.lt.s32.totalorder %s79_s22, %s79_s22 }
   0xd   :  { %p86_p6 = por %p85_p5, %p84_p4 }
   0xf   :  { %p87_p7 = pnand %p86_p6, %p80_p3 }
  0x11   :  { %90 = shalt.err (!%p87_p7)
}
  0x12   :  { %21 = dma.hbm_to_vmem [thread:$0]  %s202_s1, 128, %s19_s13, [#allocation5]  }
  0x13   :  { %s91_s27 = scalar_lea.hbm %s203_s2, 128 }
  0x14   :  { %p92_p8 = scmp.ne.s32.totalorder %s203_s2, %s91_s27  ;;  %p95_p9 = scmp.lt.u32.totalorder %s91_s27, %s203_s2 }
  0x16   :  { %p97_p10 = pnand %p95_p9, %p92_p8 }
  0x18   :  { %100 = shalt.err (!%p97_p10)
}
  0x19   :  { %s101_s5 = scalar_lea.vmem %s29_s15, 128  ;;  %p106_p12 = scmp.lt.s32.totalorder %s29_s15, %s29_s15 }
  0x1a   :  { %p102_p11 = scmp.ne.s32.totalorder %s29_s15, %s101_s5  ;;  %p107_p13 = scmp.lt.s32.totalorder %s101_s5, %s101_s5 }
  0x1c   :  { %p108_p0 = por %p107_p13, %p106_p12 }
  0x1e   :  { %p109_p1 = pnand %p108_p0, %p102_p11 }
  0x20   :  { %112 = shalt.err (!%p109_p1)
}
  0x21   :  { %31 = dma.hbm_to_vmem [thread:$0]  %s203_s2, 128, %s29_s15, [#allocation8]  }
  0x22   :  { %135 = dma.done.wait [#allocation5], 128  }
  0x23   :  { %136 = vsyncadd [#allocation5], 4294967168 }
  0x24   :  { %137 = dma.done.wait [#allocation8], 128  }
  0x25   :  { %138 = vsyncadd [#allocation8], 4294967168  ;;  %v39_v0 = vld [vmem:[#allocation7] sm:$0xff]  ;;  %s143_s7 = smov 32   ;;  %vm44_vm0 = vcmask 261120   ;;  %v38_v1 = vld [vmem:[#allocation4] sm:$0xff] }
  0x26   :  { %41 = vrot.lane.b32.xlu0 %v39_v0, %s143_s7  ;;  %s144_s8 = smov [#allocation9]   ;;  %vm47_vm1 = vcmask 523264  }
  0x27   :  { %s55_s9 = sshll.u32 %s144_s8, 4  ;;  %s56_s9 = int_to_ptr.vmem [resolvable:$true] %s55_s9 }
  0x28   :  { %s113_s10 = scalar_lea.vmem %s56_s9, 128  ;;  %p118_p3 = scmp.lt.s32.totalorder %s56_s9, %s56_s9 }
  0x29   :  { %p114_p2 = scmp.ne.s32.totalorder %s56_s9, %s113_s10  ;;  %p119_p4 = scmp.lt.s32.totalorder %s113_s10, %s113_s10 }
  0x2b   :  { %p120_p5 = por %p119_p4, %p118_p3 }
  0x2d   :  { %p121_p6 = pnand %p120_p5, %p114_p2 }
  0x98   :  { %v42_v2 = vpop.permute.xlu0 %41 }
  0x99   :  { %v45_v3 = vsel %vm44_vm0, %v39_v0, %v42_v2 }
  0x9a   :  { %v46_v4 = vadd.f32 %v45_v3, %v38_v1 }
  0x9c   :  { %48 = vst.msk [vmem:[#allocation9] sm:$0xff] %vm47_vm1, %v46_v4 }
  0x9d   :  { %124 = shalt.err (!%p121_p6)
}
  0x9e   :  { %s125_s12 = scalar_lea.hbm %s204_s3, 128 }
  0x9f   :  { %p126_p7 = scmp.ne.s32.totalorder %s204_s3, %s125_s12  ;;  %p129_p8 = scmp.lt.u32.totalorder %s125_s12, %s204_s3 }
  0xa1   :  { %p131_p9 = pnand %p129_p8, %p126_p7 }
  0xa3   :  { %134 = shalt.err (!%p131_p9)
}
  0xa4   :  { %58 = dma.vmem_to_hbm [thread:$0]  %s56_s9, 128, %s204_s3, [#allocation6]  }
  0xa5   :  { %139 = dma.done.wait [#allocation6], 128  }
  0xa6   :  { %140 = vsyncadd [#allocation6], 4294967168 }
  0xa7   :  { %62 = vsyncpa [#allocation5], 1 }
  0xa8   :  { %63 = vsyncpa [#allocation8], 1 }
  0xa9   :  { %64 = vsyncpa [#allocation6], 1 }

</bundles_post_ra>
